<compile_context>
chip_gen: v5e
topology: v5e:2x2
jax: 0.10.0
libtpu: 0.0.40
codegen_flags: <defaults>
</compile_context>

<pallas_src>
import numpy as np
import jax
import jax.numpy as jnp
from jax.experimental import pallas as pl
from jax.experimental.pallas import tpu as pltpu


def _make_kernel(K, C_in, C_out, n_blk, n_chunks, tV, cd):
    def kernel(x_ref, abd_ref, w_ref, b_ref, o_ref):
        bias = b_ref[...]                                   # (C_out, tV) f32
        for c in range(n_chunks):                           # static unroll
            sl = pl.ds(c * tV, tV)                          # lane-aligned chunk
            for b in range(n_blk):                          # static unroll
                x_c = x_ref[b, :, sl]                       # (C_in, tV)
                acc = bias                                  # f32 accumulator
                for k in range(K):                          # K == 3, static unroll
                    # A contraction: block-diagonal matmul keeps lane layout intact.
                    xa = jnp.dot(x_c, abd_ref[k],
                                 preferred_element_type=jnp.float32)   # (C_in, tV)
                    # Channel matmul accumulated per k (no scratch roundtrip).
                    acc = acc + jnp.dot(w_ref[k], xa.astype(cd),
                                        preferred_element_type=jnp.float32)
                o_ref[b, :, sl] = acc.astype(o_ref.dtype)   # f32 epilogue, one store
    return kernel


def _pad_to(x, size, axis):
    pad = size - x.shape[axis]
    if pad == 0:
        return x
    widths = [(0, 0)] * x.ndim
    widths[axis] = (0, pad)
    return jnp.pad(x, widths)


def conv_temporal_graphical(x, A, W, bias, *, n_blk=1, chunks_per_step=None,
                            compute_dtype=jnp.bfloat16, out_dtype=None,
                            vmem_budget_bytes=20 << 20):
    """x: (N, C_in, T, V), A: (K, V, V), W: (K*C_out, C_in) squeezed 1x1 conv
    weight, bias: (K*C_out,).  Returns (y, 1) with y: (N, C_out, T, V)."""
    N, C_in, T, V = x.shape
    K = A.shape[0]
    KC = W.shape[0]
    assert KC % K == 0
    C_out = KC // K
    assert N % n_blk == 0

    cd = jnp.dtype(compute_dtype)
    od = jnp.dtype(out_dtype) if out_dtype is not None else jnp.dtype(x.dtype)

    # ---- lane geometry: pad V so a chunk of t_tile*V_pad lanes is 128-dense ----
    if V <= 128:
        V_pad = 1 << (V - 1).bit_length()        # next pow2: 18/25 -> 32, 16 -> 16
    else:
        V_pad = ((V + 127) // 128) * 128
    t_tile = max(1, 128 // V_pad)                # cap tV at 128 (waste factor bounded)
    tV = t_tile * V_pad
    T_pad = ((T + t_tile - 1) // t_tile) * t_tile
    total_chunks = T_pad // t_tile

    # ---- per-step chunk count: largest divisor of total_chunks within VMEM budget ----
    if chunks_per_step is None:
        resid = (K * tV * tV + K * C_out * C_in) * cd.itemsize + C_out * tV * 4
        chunks_per_step = 1
        for d in range(1, total_chunks + 1):
            if total_chunks % d:
                continue
            tiles = 2 * n_blk * d * tV * (C_in * cd.itemsize + C_out * od.itemsize)
            if resid + tiles <= vmem_budget_bytes:
                chunks_per_step = d
    assert total_chunks % chunks_per_step == 0
    n_tb = total_chunks // chunks_per_step
    L = chunks_per_step * tV

    # ---- one-off wrapper-side layout / parameter plumbing ----------------------
    x_p = _pad_to(_pad_to(x, V_pad, 3), T_pad, 2)            # (N, C_in, T_pad, V_pad)
    x_ld = x_p.reshape(N, C_in, T_pad * V_pad).astype(cd)    # lane-dense input
    A_p = _pad_to(_pad_to(A, V_pad, 2), V_pad, 1)            # (K, V_pad, V_pad) zero-padded
    eye = jnp.eye(t_tile, dtype=A.dtype)
    # A_bd[k] = I_{t_tile} (x) A_pad[k], shape (K, tV, tV).
    A_bd = jnp.einsum("ts,kvw->ktvsw", eye, A_p).reshape(K, tV, tV).astype(cd)
    W_k = W.reshape(K, C_out, C_in).astype(cd)                # conv channels are k-major
    # Conv bias folded through the A contraction (exact by linearity), kept f32.
    bias_eff = jnp.einsum("kc,kw->cw",
                          bias.reshape(K, C_out).astype(jnp.float32),
                          A_p.sum(axis=1).astype(jnp.float32))         # (C_out, V_pad)
    bias_lane = jnp.tile(bias_eff, (1, t_tile))                         # (C_out, tV)

    kernel = _make_kernel(K, C_in, C_out, n_blk, chunks_per_step, tV, cd)

    flops = 2 * N * total_chunks * K * (C_in * tV * tV + C_out * C_in * tV)
    bytes_accessed = (x_ld.size * cd.itemsize
                      + N * C_out * T_pad * V_pad * od.itemsize
                      + A_bd.size * cd.itemsize + W_k.size * cd.itemsize
                      + bias_lane.size * 4)

    out = pl.pallas_call(
        kernel,
        out_shape=jax.ShapeDtypeStruct((N, C_out, T_pad * V_pad), od),
        grid=(N // n_blk, n_tb),
        in_specs=[
            pl.BlockSpec((n_blk, C_in, L), lambda n, t: (n, 0, t)),      # x tile
            pl.BlockSpec((K, tV, tV), lambda n, t: (0, 0, 0)),           # A_bd (resident)
            pl.BlockSpec((K, C_out, C_in), lambda n, t: (0, 0, 0)),      # W (resident)
            pl.BlockSpec((C_out, tV), lambda n, t: (0, 0)),              # bias (resident)
        ],
        out_specs=pl.BlockSpec((n_blk, C_out, L), lambda n, t: (n, 0, t)),
        compiler_params=pltpu.CompilerParams(
            dimension_semantics=("parallel", "parallel"),
            vmem_limit_bytes=32 * 1024 * 1024),
        cost_estimate=pl.CostEstimate(flops=int(flops), transcendentals=0,
                                      bytes_accessed=int(bytes_accessed)),
    )(x_ld, A_bd, W_k, bias_lane)

    y = out.reshape(N, C_out, T_pad, V_pad)[:, :, :T, :V]
    return y, 1  # module returns (x.contiguous(), 1)


def reference(x, A, W, bias):
    """Pure-JAX f32 reference matching the PyTorch forward exactly."""
    K = A.shape[0]
    C_out = W.shape[0] // K
    N, C_in, T, V = x.shape
    z = jnp.einsum("oc,nctv->notv", W, x) + bias[None, :, None, None]
    z = z.reshape(N, K, C_out, T, V)
    return jnp.einsum("nkctv,kvw->nctw", z, A)


if __name__ == "__main__":
    key = jax.random.PRNGKey(0)

    # --- primary demo shapes (K, the spatial kernel size, is 3) -----------------
    N, C_in, C_out, T, V, K = 2, 4, 8, 16, 16, 3
    kx, ka, kw, kb = jax.random.split(key, 4)
    x = jax.random.normal(kx, (N, C_in, T, V), dtype=jnp.float32)
    A = jax.random.normal(ka, (K, V, V), dtype=jnp.float32)
    W = jax.random.normal(kw, (K * C_out, C_in), dtype=jnp.float32) * 0.1
    bias = jax.random.normal(kb, (K * C_out,), dtype=jnp.float32) * 0.1

    y_ref = jax.block_until_ready(reference(x, A, W, bias))

    # f32 compute path: tight check against the PyTorch-equivalent reference.
    y32, one = conv_temporal_graphical(x, A, W, bias, compute_dtype=jnp.float32)
    y32 = jax.block_until_ready(y32)
    assert y32.shape == (N, C_out, T, V) and one == 1
    np.testing.assert_allclose(np.asarray(y32), np.asarray(y_ref),
                               rtol=1e-4, atol=1e-4)

    # bf16 production path (MXU-native rate, f32 accumulation), folding 2 batch
    # elements per grid step; compare against the same math on bf16-rounded inputs.
    ybf, _ = conv_temporal_graphical(x, A, W, bias, n_blk=2,
                                     compute_dtype=jnp.bfloat16)
    ybf = jax.block_until_ready(ybf)
    xb = x.astype(jnp.bfloat16).astype(jnp.float32)
    Ab = A.astype(jnp.bfloat16).astype(jnp.float32)
    Wb = W.astype(jnp.bfloat16).astype(jnp.float32)
    y_ref_bf = jax.block_until_ready(reference(xb, Ab, Wb, bias))
    np.testing.assert_allclose(np.asarray(ybf), np.asarray(y_ref_bf),
                               rtol=2e-2, atol=2e-2)

    # V that does not divide 128 (exercises the zero-pad path used for the real
    # ST-GCN graphs with V=18/25), and C_in=3 like the first ST-GCN layer.
    N2, Ci2, Co2, T2, V2 = 2, 3, 4, 8, 10
    k2 = jax.random.split(kb, 4)
    x2 = jax.random.normal(k2[0], (N2, Ci2, T2, V2), dtype=jnp.float32)
    A2 = jax.random.normal(k2[1], (K, V2, V2), dtype=jnp.float32)
    W2 = jax.random.normal(k2[2], (K * Co2, Ci2), dtype=jnp.float32) * 0.1
    b2 = jax.random.normal(k2[3], (K * Co2,), dtype=jnp.float32) * 0.1
    y2, _ = conv_temporal_graphical(x2, A2, W2, b2, compute_dtype=jnp.float32)
    y2 = jax.block_until_ready(y2)
    np.testing.assert_allclose(np.asarray(y2),
                               np.asarray(reference(x2, A2, W2, b2)),
                               rtol=1e-4, atol=1e-4)

    print("KERNEL_OK")
</pallas_src>

<mosaic_0001>
module attributes {stable_mosaic.version = 11 : i64} {
  func.func @kernel(%arg0: i32, %arg1: i32, %arg2: memref<1x4x256xf32, #tpu.memory_space<vmem>>, %arg3: memref<3x128x128xf32, #tpu.memory_space<vmem>>, %arg4: memref<3x8x4xf32, #tpu.memory_space<vmem>>, %arg5: memref<8x128xf32, #tpu.memory_space<vmem>>, %arg6: memref<1x8x256xf32, #tpu.memory_space<vmem>>) attributes {dimension_semantics = [#tpu.dimension_semantics<parallel>, #tpu.dimension_semantics<parallel>], iteration_bounds = array<i64: 2, 1>, scalar_prefetch = 0 : i64, scratch_operands = 0 : i64, tpu.core_type = #tpu.core_type<tc>, window_params = [{transform_indices = @transform_0, window_bounds = array<i64: 1, 4, 256>}, {pipeline_mode = #tpu.pipeline_mode<synchronous>, transform_indices = @transform_1, window_bounds = array<i64: 3, 128, 128>}, {pipeline_mode = #tpu.pipeline_mode<synchronous>, transform_indices = @transform_2, window_bounds = array<i64: 3, 8, 4>}, {pipeline_mode = #tpu.pipeline_mode<synchronous>, transform_indices = @transform_3, window_bounds = array<i64: 8, 128>}, {transform_indices = @transform_4, window_bounds = array<i64: 1, 8, 256>}]} {
    %c0 = arith.constant 0 : index
    %c0_0 = arith.constant 0 : index
    %0 = vector.load %arg5[%c0, %c0_0] : memref<8x128xf32, #tpu.memory_space<vmem>>, vector<8x128xf32>
    %c0_1 = arith.constant 0 : index
    %c0_2 = arith.constant 0 : index
    %c0_3 = arith.constant 0 : index
    %1 = vector.load %arg2[%c0_1, %c0_2, %c0_3] : memref<1x4x256xf32, #tpu.memory_space<vmem>>, vector<1x4x128xf32>
    %2 = vector.shape_cast %1 : vector<1x4x128xf32> to vector<4x128xf32>
    %c0_4 = arith.constant 0 : index
    %c0_5 = arith.constant 0 : index
    %c0_6 = arith.constant 0 : index
    %3 = vector.load %arg3[%c0_4, %c0_5, %c0_6] : memref<3x128x128xf32, #tpu.memory_space<vmem>>, vector<1x128x128xf32>
    %4 = vector.shape_cast %3 : vector<1x128x128xf32> to vector<128x128xf32>
    %cst = arith.constant dense<0.000000e+00> : vector<4x128xf32>
    %5 = tpu.matmul %2, %4, %cst {dimension_numbers = #tpu.dot_dimension_numbers<[1], [0], [0], [1], [0, 0, 1, 1], [], []>} : vector<4x128xf32>, vector<128x128xf32>, vector<4x128xf32> -> vector<4x128xf32>
    %c0_7 = arith.constant 0 : index
    %c0_8 = arith.constant 0 : index
    %c0_9 = arith.constant 0 : index
    %6 = vector.load %arg4[%c0_7, %c0_8, %c0_9] : memref<3x8x4xf32, #tpu.memory_space<vmem>>, vector<1x8x4xf32>
    %7 = vector.shape_cast %6 : vector<1x8x4xf32> to vector<8x4xf32>
    %cst_10 = arith.constant dense<0.000000e+00> : vector<8x128xf32>
    %8 = tpu.matmul %7, %5, %cst_10 {dimension_numbers = #tpu.dot_dimension_numbers<[1], [0], [0], [1], [0, 0, 1, 1], [], []>} : vector<8x4xf32>, vector<4x128xf32>, vector<8x128xf32> -> vector<8x128xf32>
    %9 = arith.addf %0, %8 : vector<8x128xf32>
    %c1 = arith.constant 1 : index
    %c0_11 = arith.constant 0 : index
    %c0_12 = arith.constant 0 : index
    %10 = vector.load %arg3[%c1, %c0_11, %c0_12] : memref<3x128x128xf32, #tpu.memory_space<vmem>>, vector<1x128x128xf32>
    %11 = vector.shape_cast %10 : vector<1x128x128xf32> to vector<128x128xf32>
    %cst_13 = arith.constant dense<0.000000e+00> : vector<4x128xf32>
    %12 = tpu.matmul %2, %11, %cst_13 {dimension_numbers = #tpu.dot_dimension_numbers<[1], [0], [0], [1], [0, 0, 1, 1], [], []>} : vector<4x128xf32>, vector<128x128xf32>, vector<4x128xf32> -> vector<4x128xf32>
    %c1_14 = arith.constant 1 : index
    %c0_15 = arith.constant 0 : index
    %c0_16 = arith.constant 0 : index
    %13 = vector.load %arg4[%c1_14, %c0_15, %c0_16] : memref<3x8x4xf32, #tpu.memory_space<vmem>>, vector<1x8x4xf32>
    %14 = vector.shape_cast %13 : vector<1x8x4xf32> to vector<8x4xf32>
    %cst_17 = arith.constant dense<0.000000e+00> : vector<8x128xf32>
    %15 = tpu.matmul %14, %12, %cst_17 {dimension_numbers = #tpu.dot_dimension_numbers<[1], [0], [0], [1], [0, 0, 1, 1], [], []>} : vector<8x4xf32>, vector<4x128xf32>, vector<8x128xf32> -> vector<8x128xf32>
    %16 = arith.addf %9, %15 : vector<8x128xf32>
    %c2 = arith.constant 2 : index
    %c0_18 = arith.constant 0 : index
    %c0_19 = arith.constant 0 : index
    %17 = vector.load %arg3[%c2, %c0_18, %c0_19] : memref<3x128x128xf32, #tpu.memory_space<vmem>>, vector<1x128x128xf32>
    %18 = vector.shape_cast %17 : vector<1x128x128xf32> to vector<128x128xf32>
    %cst_20 = arith.constant dense<0.000000e+00> : vector<4x128xf32>
    %19 = tpu.matmul %2, %18, %cst_20 {dimension_numbers = #tpu.dot_dimension_numbers<[1], [0], [0], [1], [0, 0, 1, 1], [], []>} : vector<4x128xf32>, vector<128x128xf32>, vector<4x128xf32> -> vector<4x128xf32>
    %c2_21 = arith.constant 2 : index
    %c0_22 = arith.constant 0 : index
    %c0_23 = arith.constant 0 : index
    %20 = vector.load %arg4[%c2_21, %c0_22, %c0_23] : memref<3x8x4xf32, #tpu.memory_space<vmem>>, vector<1x8x4xf32>
    %21 = vector.shape_cast %20 : vector<1x8x4xf32> to vector<8x4xf32>
    %cst_24 = arith.constant dense<0.000000e+00> : vector<8x128xf32>
    %22 = tpu.matmul %21, %19, %cst_24 {dimension_numbers = #tpu.dot_dimension_numbers<[1], [0], [0], [1], [0, 0, 1, 1], [], []>} : vector<8x4xf32>, vector<4x128xf32>, vector<8x128xf32> -> vector<8x128xf32>
    %23 = arith.addf %16, %22 : vector<8x128xf32>
    %c0_25 = arith.constant 0 : index
    %c0_26 = arith.constant 0 : index
    %c0_27 = arith.constant 0 : index
    %24 = vector.load %arg6[%c0_25, %c0_26, %c0_27] : memref<1x8x256xf32, #tpu.memory_space<vmem>>, vector<1x8x128xf32>
    %25 = vector.shape_cast %24 : vector<1x8x128xf32> to vector<8x128xf32>
    %26 = vector.shape_cast %23 : vector<8x128xf32> to vector<1x8x128xf32>
    tpu.vector_store %arg6[%c0_25, %c0_26, %c0_27], %26 {strides = array<i32>} : memref<1x8x256xf32, #tpu.memory_space<vmem>>, vector<1x8x128xf32>,
    %c0_28 = arith.constant 0 : index
    %c0_29 = arith.constant 0 : index
    %c128 = arith.constant 128 : index
    %27 = vector.load %arg2[%c0_28, %c0_29, %c128] : memref<1x4x256xf32, #tpu.memory_space<vmem>>, vector<1x4x128xf32>
    %28 = vector.shape_cast %27 : vector<1x4x128xf32> to vector<4x128xf32>
    %c0_30 = arith.constant 0 : index
    %c0_31 = arith.constant 0 : index
    %c0_32 = arith.constant 0 : index
    %29 = vector.load %arg3[%c0_30, %c0_31, %c0_32] : memref<3x128x128xf32, #tpu.memory_space<vmem>>, vector<1x128x128xf32>
    %30 = vector.shape_cast %29 : vector<1x128x128xf32> to vector<128x128xf32>
    %cst_33 = arith.constant dense<0.000000e+00> : vector<4x128xf32>
    %31 = tpu.matmul %28, %30, %cst_33 {dimension_numbers = #tpu.dot_dimension_numbers<[1], [0], [0], [1], [0, 0, 1, 1], [], []>} : vector<4x128xf32>, vector<128x128xf32>, vector<4x128xf32> -> vector<4x128xf32>
    %c0_34 = arith.constant 0 : index
    %c0_35 = arith.constant 0 : index
    %c0_36 = arith.constant 0 : index
    %32 = vector.load %arg4[%c0_34, %c0_35, %c0_36] : memref<3x8x4xf32, #tpu.memory_space<vmem>>, vector<1x8x4xf32>
    %33 = vector.shape_cast %32 : vector<1x8x4xf32> to vector<8x4xf32>
    %cst_37 = arith.constant dense<0.000000e+00> : vector<8x128xf32>
    %34 = tpu.matmul %33, %31, %cst_37 {dimension_numbers = #tpu.dot_dimension_numbers<[1], [0], [0], [1], [0, 0, 1, 1], [], []>} : vector<8x4xf32>, vector<4x128xf32>, vector<8x128xf32> -> vector<8x128xf32>
    %35 = arith.addf %0, %34 : vector<8x128xf32>
    %c1_38 = arith.constant 1 : index
    %c0_39 = arith.constant 0 : index
    %c0_40 = arith.constant 0 : index
    %36 = vector.load %arg3[%c1_38, %c0_39, %c0_40] : memref<3x128x128xf32, #tpu.memory_space<vmem>>, vector<1x128x128xf32>
    %37 = vector.shape_cast %36 : vector<1x128x128xf32> to vector<128x128xf32>
    %cst_41 = arith.constant dense<0.000000e+00> : vector<4x128xf32>
    %38 = tpu.matmul %28, %37, %cst_41 {dimension_numbers = #tpu.dot_dimension_numbers<[1], [0], [0], [1], [0, 0, 1, 1], [], []>} : vector<4x128xf32>, vector<128x128xf32>, vector<4x128xf32> -> vector<4x128xf32>
    %c1_42 = arith.constant 1 : index
    %c0_43 = arith.constant 0 : index
    %c0_44 = arith.constant 0 : index
    %39 = vector.load %arg4[%c1_42, %c0_43, %c0_44] : memref<3x8x4xf32, #tpu.memory_space<vmem>>, vector<1x8x4xf32>
    %40 = vector.shape_cast %39 : vector<1x8x4xf32> to vector<8x4xf32>
    %cst_45 = arith.constant dense<0.000000e+00> : vector<8x128xf32>
    %41 = tpu.matmul %40, %38, %cst_45 {dimension_numbers = #tpu.dot_dimension_numbers<[1], [0], [0], [1], [0, 0, 1, 1], [], []>} : vector<8x4xf32>, vector<4x128xf32>, vector<8x128xf32> -> vector<8x128xf32>
    %42 = arith.addf %35, %41 : vector<8x128xf32>
    %c2_46 = arith.constant 2 : index
    %c0_47 = arith.constant 0 : index
    %c0_48 = arith.constant 0 : index
    %43 = vector.load %arg3[%c2_46, %c0_47, %c0_48] : memref<3x128x128xf32, #tpu.memory_space<vmem>>, vector<1x128x128xf32>
    %44 = vector.shape_cast %43 : vector<1x128x128xf32> to vector<128x128xf32>
    %cst_49 = arith.constant dense<0.000000e+00> : vector<4x128xf32>
    %45 = tpu.matmul %28, %44, %cst_49 {dimension_numbers = #tpu.dot_dimension_numbers<[1], [0], [0], [1], [0, 0, 1, 1], [], []>} : vector<4x128xf32>, vector<128x128xf32>, vector<4x128xf32> -> vector<4x128xf32>
    %c2_50 = arith.constant 2 : index
    %c0_51 = arith.constant 0 : index
    %c0_52 = arith.constant 0 : index
    %46 = vector.load %arg4[%c2_50, %c0_51, %c0_52] : memref<3x8x4xf32, #tpu.memory_space<vmem>>, vector<1x8x4xf32>
    %47 = vector.shape_cast %46 : vector<1x8x4xf32> to vector<8x4xf32>
    %cst_53 = arith.constant dense<0.000000e+00> : vector<8x128xf32>
    %48 = tpu.matmul %47, %45, %cst_53 {dimension_numbers = #tpu.dot_dimension_numbers<[1], [0], [0], [1], [0, 0, 1, 1], [], []>} : vector<8x4xf32>, vector<4x128xf32>, vector<8x128xf32> -> vector<8x128xf32>
    %49 = arith.addf %42, %48 : vector<8x128xf32>
    %c0_54 = arith.constant 0 : index
    %c0_55 = arith.constant 0 : index
    %c128_56 = arith.constant 128 : index
    %50 = vector.load %arg6[%c0_54, %c0_55, %c128_56] : memref<1x8x256xf32, #tpu.memory_space<vmem>>, vector<1x8x128xf32>
    %51 = vector.shape_cast %50 : vector<1x8x128xf32> to vector<8x128xf32>
    %52 = vector.shape_cast %49 : vector<8x128xf32> to vector<1x8x128xf32>
    tpu.vector_store %arg6[%c0_54, %c0_55, %c128_56], %52 {strides = array<i32>} : memref<1x8x256xf32, #tpu.memory_space<vmem>>, vector<1x8x128xf32>,
    return
  }
  func.func @transform_0(%arg0: i32, %arg1: i32) -> (i32, i32, i32) {
    %c0_i32 = arith.constant 0 : i32
    %c0_i32_0 = arith.constant 0 : i32
    return %arg0, %c0_i32, %arg1 : i32, i32, i32
  }
  func.func @transform_1(%arg0: i32, %arg1: i32) -> (i32, i32, i32) {
    %c0_i32 = arith.constant 0 : i32
    %c0_i32_0 = arith.constant 0 : i32
    %c0_i32_1 = arith.constant 0 : i32
    %c0_i32_2 = arith.constant 0 : i32
    return %c0_i32, %c0_i32_0, %c0_i32_1 : i32, i32, i32
  }
  func.func @transform_2(%arg0: i32, %arg1: i32) -> (i32, i32, i32) {
    %c0_i32 = arith.constant 0 : i32
    %c0_i32_0 = arith.constant 0 : i32
    %c0_i32_1 = arith.constant 0 : i32
    %c0_i32_2 = arith.constant 0 : i32
    return %c0_i32, %c0_i32_0, %c0_i32_1 : i32, i32, i32
  }
  func.func @transform_3(%arg0: i32, %arg1: i32) -> (i32, i32) {
    %c0_i32 = arith.constant 0 : i32
    %c0_i32_0 = arith.constant 0 : i32
    %c0_i32_1 = arith.constant 0 : i32
    return %c0_i32, %c0_i32_0 : i32, i32
  }
  func.func @transform_4(%arg0: i32, %arg1: i32) -> (i32, i32, i32) {
    %c0_i32 = arith.constant 0 : i32
    %c0_i32_0 = arith.constant 0 : i32
    return %arg0, %c0_i32, %arg1 : i32, i32, i32
  }
}

</mosaic_0001>

<bundles_post_ra>
// kernel: tpu_custom_call.1
= control target key start
LH: loop header
LB: loop body
LE: loop exit
PB: predicated region body
PF: predicated region fallthrough
CT: control target
= control target key end

     0   :  { %9 = vsyncpa [#allocation3], 0  ;;  %s1206_s0 = inlined_call_operand.vmem [shape: f32[2,4,256], index: 0, kind: input, shape index: {}]   ;;  %s1207_s1 = inlined_call_operand.hbm [shape: f32[3,128,128], index: 1, kind: input, shape index: {}]   ;;  %s1208_s2 = inlined_call_operand.vmem [shape: f32[3,8,4], index: 2, kind: input, shape index: {}]   ;;  %s1209_s3 = inlined_call_operand.vmem [shape: f32[8,128], index: 3, kind: input, shape index: {}]   ;;  %s1210_s4 = inlined_call_operand.hbm [shape: f32[2,8,256], index: 4, kind: output, shape index: {}]  }
   0x1   :  { %10 = vsyncpa [#allocation4], 0 }
   0x2   :  { %12 = vsyncpa [#allocation4 + $0x1], 0  ;;  %s989_s15 = smov 0   ;;  %s991_s16 = smov 0  }
   0x3   :  { %s993_s17 = smov 0   ;;  %s995_s18 = smov 0  }
   0x4   :  { %s997_s19 = smov 0   ;;  %s999_s20 = smov 0  }
   0x5 LB: > { %s746_s21 = sadd.s32 4294967295, %s959_s20   ;;  %s747_s22 = sadd.s32 4294967294, %s959_s20   ;;  %s959_s20 = sphi %s999_s20, %s18_s20   ;;  %s955_s19 = sphi %s997_s19, %s1217_s19   ;;  %s951_s18 = sphi %s995_s18, %s1216_s18   ;;  %s947_s17 = sphi %s993_s17, %s1215_s17   ;;  %s943_s16 = sphi %s991_s16, %s1214_s16   ;;  %s939_s15 = sphi %s989_s15, %s1213_s15  }
   0x6   : > { %s30_s23 = sadd.s32 1, %s955_s19  ;;  %s130_s24 = sadd.s32 1, %s947_s17 }
   0x7   : > { %p32_p0 = scmp.ge.s32.totalorder %s30_s23, 2  ;;  %p140_p1 = scmp.ne.s32.totalorder %s947_s17, %s943_s16 }
   0x8   : > { %p141_p2 = scmp.eq.s32.totalorder %s746_s21, 1  ;;  %p146_p3 = scmp.ne.s32.totalorder %s943_s16, %s939_s15 }
   0x9   : > { %s1219_s23 = smov (%p32_p0, %s30_s23), 0  ;;  %p147_p5 = scmp.eq.s32.totalorder %s747_s22, 1 }
   0xa   : > { %p1029_p4 = por %p141_p2, %p140_p1  ;;  %s125_s26 = ssub.s32 %s955_s19, %s1219_s23 }
   0xb   : > { %p748_p6 = scmp.ge.s32.totalorder %s959_s20, 1  ;;  %p128_p7 = scmp.eq.s32.totalorder %s125_s26, 0 }
   0xc   : > { %p1036_p8 = por %p147_p5, %p146_p3  ;;  %p154_p9 = scmp.lt.s32.totalorder %s959_s20, 3 }
   0xd   : > { %s1042_s28 = scalar_select %p128_p7, %s947_s17, %s130_s24  }
   0xe   : > { %p155_p10 = pnand %p748_p6, %p154_p9  ;;  %p793_p11 = scmp.eq.s32.totalorder %s746_s21, 0 }
   0xf   : > { %s165_s5 = sshll.u32 %s1207_s1, 4  ;;  %s961_s6 = smov [#allocation2]   ;;  %s166_s5 = int_to_ptr.hbm [resolvable:$true] %s165_s5 }
  0x10   : > { %p785_p12 = pneg %p155_p10  ;;  %s167_s7 = sshll.u32 %s961_s6, 4  ;;  %s168_s7 = int_to_ptr.vmem [resolvable:$true] %s167_s7 }
  0x11   : > { %s962_s8 = smov 128   ;;  %s963_s9 = smov 8  }
  0x12   : > { %p786_p13 = pnand %p793_p11, %p785_p12  ;;  %202 = sbr.rel (%p155_p10) target bundleno = 648 (0x288), region = 36 }
  0x14   : > { %788 = dma.hbm_to_vmem [thread:$0]  (!%p786_p13), %s166_s5, 6144, %s168_s7, [#allocation3], %s962_s8, %s962_s8, %s963_s9  }
  0x17   : > { %930 = dma.done.wait (%p793_p11), [#allocation3], 6144  }
  0x18   : > { %932 = vsyncadd (%p793_p11), [#allocation3], 4294961152  ;;  %v1047_v0 = vld [vmem:[#allocation2 + $0x78] sm:$0xff]  ;;  %v1049_v1 = vld [vmem:[#allocation2 + $0x70] sm:$0xff]  ;;  %p234_p0 = scmp.lt.s32.totalorder %s951_s18, 1  ;;  %vm287_vm0 = vcmask 1043456  }
  0x19   : > { %262 = vmatpush.msra.mxu0 %v1047_v0  ;;  %v1052_v2 = vld [vmem:[#allocation2 + $0x68] sm:$0xff]  ;;  %v1054_v3 = vld [vmem:[#allocation2 + $0xf8] sm:$0xff]  ;;  %v1058_v4 = vld [vmem:[#allocation2 + $0xf0] sm:$0xff]  ;;  %vm283_vm1 = vcmask 31744   ;;  %s230_s7 = sand.u32 1, %s943_s16   ;;  %s897_s30 = scalar_lea.hbm %s1210_s4, 32 }
  0x1a   : > { %329 = vmatpush.msra.mxu2 %v1054_v3  ;;  %v1060_v5 = vld [vmem:[#allocation2 + $0x60] sm:$0xff]  ;;  %v1062_v6 = vld [vmem:[#allocation2 + $0xe8] sm:$0xff]  ;;  %v1066_v7 = vld [vmem:[#allocation2 + $0x58] sm:$0xff]  ;;  %s235_s10 = scalar_select %p234_p0, %s951_s18, 1 }
  0x1b   : > { %263 = vmatpush.msra.mxu0 %v1049_v1  ;;  %v325_v8 = vld [vmem:[#allocation2 + $0xe0] sm:$0xff]  ;;  %v1070_v9 = vld [vmem:[#allocation2 + $0x50] sm:$0xff]  ;;  %v324_v10 = vld [vmem:[#allocation2 + $0xd8] sm:$0xff]  ;;  %s753_s8 = sshll.u32 %s230_s7, 4  ;;  %s640_s22 = scalar_lea.sflag [#allocation4], %s230_s7 }
  0x1c   : > { %330 = vmatpush.msra.mxu2 %v1058_v4  ;;  %v1073_v11 = vld [vmem:[#allocation2 + $0x48] sm:$0xff]  ;;  %v323_v12 = vld [vmem:[#allocation2 + $0xd0] sm:$0xff]  ;;  %v1076_v13 = vld [vmem:[#allocation2 + $0x40] sm:$0xff]  ;;  %s777_s11 = sshll.u32 %s235_s10, 3  ;;  %s232_s9 = scalar_lea.vmem [#allocation5], %s753_s8 }
  0x1d   : > { %264 = vmatpush.msra.mxu0 %v1052_v2  ;;  %v322_v14 = vld [vmem:[#allocation2 + $0xc8] sm:$0xff]  ;;  %v1079_v15 = vld [vmem:[#allocation2 + $0x38] sm:$0xff]  ;;  %v321_v16 = vld [vmem:[#allocation2 + $0xc0] sm:$0xff]  ;;  %s1104_s14 = scalar_lea.vmem %s1206_s0, %s777_s11  ;;  %s778_s10 = sshll.u32 %s951_s18, 4 }
  0x1e   : > { %331 = vmatpush.msra.mxu2 %v1062_v6  ;;  %v1083_v17 = vld [vmem:[#allocation2 + $0x30] sm:$0xff]  ;;  %v320_v18 = vld [vmem:[#allocation2 + $0xb8] sm:$0xff]  ;;  %v1086_v19 = vld [vmem:[#allocation2 + $0x28] sm:$0xff]  ;;  %s653_s13 = scalar_lea.hbm %s1210_s4, %s778_s10 }
  0x1f   : > { %265 = vmatpush.msra.mxu0 %v1060_v5  ;;  %v319_v20 = vld [vmem:[#allocation2 + $0xb0] sm:$0xff]  ;;  %v1090_v21 = vld [vmem:[#allocation2 + $0x20] sm:$0xff]  ;;  %v318_v22 = vld [vmem:[#allocation2 + $0xa8] sm:$0xff]  ;;  %s657_s21 = sshll.u32 %s653_s13, 4  ;;  %s658_s21 = int_to_ptr.hbm [resolvable:$true] %s657_s21 }
  0x20   : > { %332 = vmatpush.msra.mxu2 %v325_v8  ;;  %v1093_v23 = vld [vmem:[#allocation2 + $0x18] sm:$0xff]  ;;  %v317_v24 = vld [vmem:[#allocation2 + $0xa0] sm:$0xff]  ;;  %v1096_v25 = vld [vmem:[#allocation2 + $0x10] sm:$0xff]  ;;  %s891_s24 = sshra.s32 %s658_s21, 4  ;;  %s892_s24 = int_to_ptr.hbm [resolvable:$true] %s891_s24 }
  0x21   : > { %266 = vmatpush.msra.mxu0 %v1066_v7  ;;  %v316_v26 = vld [vmem:[#allocation2 + $0x98] sm:$0xff]  ;;  %v1099_v27 = vld [vmem:[#allocation2 + $0x8] sm:$0xff]  ;;  %v315_v28 = vld [vmem:[#allocation2 + $0x90] sm:$0xff]  ;;  %s893_s18 = scalar_lea.hbm %s892_s24, 16  ;;  %p898_p5 = scmp.lt.s32.totalorder %s892_s24, %s1210_s4 }
  0x22   : > { %333 = vmatpush.msra.mxu2 %v324_v10  ;;  %v1107_v29 = vld [vmem:[#allocation2] sm:$0xff]  ;;  %v314_v30 = vld [vmem:[#allocation2 + $0x88] sm:$0xff]  ;;  %v394_v33 = vld [vmem:[#allocation2 + $0x178] sm:$0xff]  ;;  %p894_p1 = scmp.ne.s32.totalorder %s892_s24, %s893_s18  ;;  %p899_p6 = scmp.lt.s32.totalorder %s897_s30, %s893_s18 }
  0x23   : > { %267 = vmatpush.msra.mxu0 %v1070_v9  ;;  %v1111_v31 = vld [vmem:[%s1104_s14] sm:$0xf]  ;;  %v393_v34 = vld [vmem:[#allocation2 + $0x170] sm:$0xff]  ;;  %v392_v35 = vld [vmem:[#allocation2 + $0x168] sm:$0xff] }
  0x24   : > { %334 = vmatpush.msra.mxu2 %v323_v12  ;;  %v313_v32 = vld [vmem:[#allocation2 + $0x80] sm:$0xff]  ;;  %v390_v37 = vld [vmem:[#allocation2 + $0x158] sm:$0xff]  ;;  %v389_v38 = vld [vmem:[#allocation2 + $0x150] sm:$0xff]  ;;  %p895_p2 = pnand %p894_p1, %p1029_p4  ;;  %p900_p7 = por %p899_p6, %p898_p5 }
  0x25   : > { %268 = vmatpush.msra.mxu0 %v1073_v11  ;;  %v391_v36 = vld [vmem:[#allocation2 + $0x160] sm:$0xff]  ;;  %v388_v39 = vld [vmem:[#allocation2 + $0x148] sm:$0xff]  ;;  %v386_v41 = vld [vmem:[#allocation2 + $0x138] sm:$0xff] }
  0x26   : > { %335 = vmatpush.msra.mxu2 %v322_v14  ;;  %v387_v40 = vld [vmem:[#allocation2 + $0x140] sm:$0xff]  ;;  %v385_v42 = vld [vmem:[#allocation2 + $0x130] sm:$0xff]  ;;  %v384_v43 = vld [vmem:[#allocation2 + $0x128] sm:$0xff]  ;;  %p896_p3 = pneg %p895_p2 }
  0x27   : > { %269 = vmatpush.msra.mxu0 %v1076_v13  ;;  %v383_v44 = vld [vmem:[#allocation2 + $0x120] sm:$0xff]  ;;  %v382_v45 = vld [vmem:[#allocation2 + $0x118] sm:$0xff]  ;;  %v381_v46 = vld [vmem:[#allocation2 + $0x110] sm:$0xff] }
  0x28   : > { %336 = vmatpush.msra.mxu2 %v321_v16  ;;  %v380_v47 = vld [vmem:[#allocation2 + $0x108] sm:$0xff]  ;;  %v379_v48 = vld [vmem:[#allocation2 + $0x100] sm:$0xff]  ;;  %v761_v54 = vld [vmem:[%s1208_s2 + $0x10] sm:$0xff]  ;;  %p901_p9 = pnand %p900_p7, %p896_p3 }
  0x29   : > { %270 = vmatpush.msra.mxu0 %v1079_v15  ;;  %v1122_v50 = vld [vmem:[%s1208_s2] sm:$0xff]  ;;  %v758_v51 = vld [vmem:[%s1208_s2 + $0x8] sm:$0xff] }
  0x2a   : > { %337 = vmatpush.msra.mxu2 %v320_v18  ;;  %v445_v56 = vld [vmem:[%s1104_s14 + $0x4] sm:$0xf]  ;;  %s655_s14 = sshll.u32 %s232_s9, 4  ;;  %s656_s14 = int_to_ptr.vmem [resolvable:$true] %s655_s14 }
  0x2b   : > { %271 = vmatpush.msra.mxu0 %v1083_v17  ;;  %v244_v57 = vld [vmem:[%s1209_s3] sm:$0xff] }
  0x2c   : > { %338 = vmatpush.msra.mxu2 %v319_v20 }
  0x2d   : > { %272 = vmatpush.msra.mxu0 %v1086_v19 }
  0x2e   : > { %339 = vmatpush.msra.mxu2 %v318_v22 }
  0x2f   : > { %273 = vmatpush.msra.mxu0 %v1090_v21 }
  0x30   : > { %340 = vmatpush.msra.mxu2 %v317_v24 }
  0x31   : > { %274 = vmatpush.msra.mxu0 %v1093_v23 }
  0x32   : > { %341 = vmatpush.msra.mxu2 %v316_v26 }
  0x33   : > { %275 = vmatpush.msra.mxu0 %v1096_v25 }
  0x34   : > { %342 = vmatpush.msra.mxu2 %v315_v28 }
  0x35   : > { %276 = vmatpush.msra.mxu0 %v1099_v27 }
  0x36   : > { %343 = vmatpush.msra.mxu2 %v314_v30 }
  0x37   : > { %277 = vmatpush.msra.mxu0 %v1107_v29 }
  0x38   : > { %278 = vmatmul.f32.vlgmr.msra.gmra.mxu0 %v1111_v31  ;;  %344 = vmatpush.msra.mxu2 %v313_v32 }
  0x39   : > { %345 = vmatmul.f32.vlgmr.msra.gmra.mxu2 %v1111_v31  ;;  %590 = vmatpush.msrb.mxu0 %v394_v33 }
  0x3a   : > { %526 = vmatpush.msrb.mxu2 %v1054_v3 }
  0x3b   : > { %591 = vmatpush.msrb.mxu0 %v393_v34 }
  0x3c   : > { %527 = vmatpush.msrb.mxu2 %v1058_v4 }
  0x3d   : > { %592 = vmatpush.msrb.mxu0 %v392_v35 }
  0x3e   : > { %528 = vmatpush.msrb.mxu2 %v1062_v6 }
  0x3f   : > { %593 = vmatpush.msrb.mxu0 %v391_v36 }
  0x40   : > { %529 = vmatpush.msrb.mxu2 %v325_v8 }
  0x41   : > { %594 = vmatpush.msrb.mxu0 %v390_v37 }
  0x42   : > { %530 = vmatpush.msrb.mxu2 %v324_v10 }
  0x43   : > { %595 = vmatpush.msrb.mxu0 %v389_v38 }
  0x44   : > { %531 = vmatpush.msrb.mxu2 %v323_v12 }
  0x45   : > { %596 = vmatpush.msrb.mxu0 %v388_v39 }
  0x46   : > { %532 = vmatpush.msrb.mxu2 %v322_v14 }
  0x47   : > { %597 = vmatpush.msrb.mxu0 %v387_v40 }
  0x48   : > { %533 = vmatpush.msrb.mxu2 %v321_v16 }
  0x49   : > { %598 = vmatpush.msrb.mxu0 %v386_v41 }
  0x4a   : > { %534 = vmatpush.msrb.mxu2 %v320_v18 }
  0x4b   : > { %599 = vmatpush.msrb.mxu0 %v385_v42 }
  0x4c   : > { %535 = vmatpush.msrb.mxu2 %v319_v20 }
  0x4d   : > { %600 = vmatpush.msrb.mxu0 %v384_v43 }
  0x4e   : > { %536 = vmatpush.msrb.mxu2 %v318_v22 }
  0x4f   : > { %601 = vmatpush.msrb.mxu0 %v383_v44 }
  0x50   : > { %537 = vmatpush.msrb.mxu2 %v317_v24 }
  0x51   : > { %602 = vmatpush.msrb.mxu0 %v382_v45 }
  0x52   : > { %538 = vmatpush.msrb.mxu2 %v316_v26 }
  0x53   : > { %603 = vmatpush.msrb.mxu0 %v381_v46 }
  0x54   : > { %539 = vmatpush.msrb.mxu2 %v315_v28 }
  0x55   : > { %604 = vmatpush.msrb.mxu0 %v380_v47 }
  0x56   : > { %540 = vmatpush.msrb.mxu2 %v314_v30 }
  0x57   : > { %605 = vmatpush.msrb.mxu0 %v379_v48 }
  0x58   : > { %541 = vmatpush.msrb.mxu2 %v313_v32  ;;  %606 = vmatmul.f32.vlgmr.msrb.gmra.mxu0 %v445_v56 }
  0x59   : > { %542 = vmatmul.f32.vlgmr.msrb.gmra.mxu2 %v445_v56 }
  0xb5   : > { %v279_v49 = vpop.f32.mrf.mxu0 }
  0xb6   : > { %756 = vmatpush.msk.msra.mxu1 %vm287_vm0, %v279_v49 }
  0xb7   : > { %757 = vmatmul.msk.f32.vlgmr.msra.gmra.mxu1 %vm283_vm1, %v1122_v50 }
  0xb8   : > { %395 = vmatpush.msrb.mxu1 %v394_v33 }
  0xba   : > { %396 = vmatpush.msrb.mxu1 %v393_v34 }
  0xbc   : > { %397 = vmatpush.msrb.mxu1 %v392_v35  ;;  %v346_v52 = vpop.f32.mrf.mxu2 }
  0xbd   : > { %759 = vmatpush.msk.msra.mxu3 %vm287_vm0, %v346_v52 }
  0xbe   : > { %398 = vmatpush.msrb.mxu1 %v391_v36  ;;  %760 = vmatmul.msk.f32.vlgmr.msra.gmra.mxu3 %vm283_vm1, %v758_v51 }
  0xc0   : > { %399 = vmatpush.msrb.mxu1 %v390_v37 }
  0xc2   : > { %400 = vmatpush.msrb.mxu1 %v389_v38 }
  0xc4   : > { %401 = vmatpush.msrb.mxu1 %v388_v39 }
  0xc6   : > { %402 = vmatpush.msrb.mxu1 %v387_v40 }
  0xc8   : > { %403 = vmatpush.msrb.mxu1 %v386_v41 }
  0xca   : > { %404 = vmatpush.msrb.mxu1 %v385_v42 }
  0xcc   : > { %405 = vmatpush.msrb.mxu1 %v384_v43 }
  0xce   : > { %406 = vmatpush.msrb.mxu1 %v383_v44 }
  0xd0   : > { %407 = vmatpush.msrb.mxu1 %v382_v45 }
  0xd2   : > { %408 = vmatpush.msrb.mxu1 %v381_v46 }
  0xd4   : > { %409 = vmatpush.msrb.mxu1 %v380_v47 }
  0xd6   : > { %410 = vmatpush.msrb.mxu1 %v379_v48 }
  0xd7   : > { %411 = vmatmul.f32.vlgmr.msrb.gmra.mxu1 %v1111_v31 }
  0xdc   : > { %v543_v63 = vpop.f32.mrf.mxu2 }
  0xdd   : > { %767 = vmatpush.msk.msra.mxu1 %vm287_vm0, %v543_v63 }
  0xdf   : > { %768 = vmatmul.msk.f32.vlgmr.msra.gmra.mxu1 %vm283_vm1, %v758_v51 }
 0x134   : > { %v308_v53 = vpop.f32.mrf.mxu1 }
 0x135   : > { %v311_v59 = vadd.f32 %v308_v53, %v244_v57 }
 0x141   : > { %v374_v58 = vpop.f32.mrf.mxu3 }
 0x142   : > { %v377_v60 = vadd.f32 %v374_v58, %v311_v59 }
 0x154   : > { %v412_v55 = vpop.f32.mrf.mxu1 }
 0x155   : > { %762 = vmatpush.msk.msrb.mxu3 %vm287_vm0, %v412_v55 }
 0x156   : > { %763 = vmatmul.msk.f32.vlgmr.msrb.gmra.mxu3 %vm283_vm1, %v761_v54 }
 0x157   : > { %462 = vmatpush.msra.mxu3 %v1047_v0  ;;  %v607_v0 = vpop.f32.mrf.mxu0 }
 0x158   : > { %770 = vmatpush.msk.msrb.mxu1 %vm287_vm0, %v607_v0 }
 0x159   : > { %463 = vmatpush.msra.mxu3 %v1049_v1  ;;  %771 = vmatmul.msk.f32.vlgmr.msrb.gmra.mxu1 %vm283_vm1, %v761_v54 }
 0x15b   : > { %464 = vmatpush.msra.mxu3 %v1052_v2 }
 0x15c   : > { %v570_v2 = vpop.f32.mrf.mxu1 }
 0x15d   : > { %465 = vmatpush.msra.mxu3 %v1060_v5 }
 0x15f   : > { %466 = vmatpush.msra.mxu3 %v1066_v7 }
 0x161   : > { %467 = vmatpush.msra.mxu3 %v1070_v9 }
 0x163   : > { %468 = vmatpush.msra.mxu3 %v1073_v11 }
 0x165   : > { %469 = vmatpush.msra.mxu3 %v1076_v13 }
 0x167   : > { %470 = vmatpush.msra.mxu3 %v1079_v15 }
 0x169   : > { %471 = vmatpush.msra.mxu3 %v1083_v17 }
 0x16b   : > { %472 = vmatpush.msra.mxu3 %v1086_v19 }
 0x16d   : > { %473 = vmatpush.msra.mxu3 %v1090_v21 }
 0x16f   : > { %474 = vmatpush.msra.mxu3 %v1093_v23 }
 0x171   : > { %475 = vmatpush.msra.mxu3 %v1096_v25 }
 0x173   : > { %476 = vmatpush.msra.mxu3 %v1099_v27 }
 0x175   : > { %477 = vmatpush.msra.mxu3 %v1107_v29 }
 0x176   : > { %478 = vmatmul.f32.vlgmr.msra.gmra.mxu3 %v445_v56 }
 0x1d6   : > { %v634_v5 = vpop.f32.mrf.mxu1 }
 0x1d9   : > { %v440_v61 = vpop.f32.mrf.mxu3 }
 0x1da   : > { %v443_v62 = vadd.f32 %v440_v61, %v377_v60 }
 0x1dc   : > { %444 = vst [vmem:[%s232_s9] sm:$0xff] %v443_v62 }
 0x1f9   : > { %v479_v1 = vpop.f32.mrf.mxu3 }
 0x1fa   : > { %764 = vmatpush.msk.msrb.mxu3 %vm287_vm0, %v479_v1 }
 0x1fb   : > { %765 = vmatmul.msk.f32.vlgmr.msrb.gmra.mxu3 %vm283_vm1, %v1122_v50 }
 0x27e   : > { %v506_v3 = vpop.f32.mrf.mxu3 }
 0x27f   : > { %v509_v4 = vadd.f32 %v506_v3, %v244_v57 }
 0x281   : > { %v573_v6 = vadd.f32 %v570_v2, %v509_v4 }
 0x283   : > { %v637_v7 = vadd.f32 %v634_v5, %v573_v6 }
 0x285   : > { %638 = vst [vmem:[%s232_s9 + $0x8] sm:$0xff] %v637_v7 }
 0x286   : > { %904 = shalt.err (!%p901_p9)
}
 0x287   : > { %783 = dma.vmem_to_hbm [thread:$0]  (%p1029_p4), %s656_s14, 256, %s658_s21, %s640_s22  }
 0x288 PF: > { %p795_p10 = scmp.ge.s32.totalorder %s959_s20, 2  ;;  %s669_s7 = sand.u32 1, %s939_s15  }
 0x289   : > { %s670_s8 = scalar_lea.sflag [#allocation4], %s669_s7 }
 0x28a   : > { %p790_p11 = pnand %p795_p10, %p1036_p8 }
 0x28c   : > { %p791_p12 = pneg %p790_p11 }
 0x28e   : > { %934 = dma.done.wait (%p791_p12), %s670_s8, 256  }
 0x28f   : > { %936 = vsyncadd (%p791_p12), %s670_s8, 4294967040  ;;  %s18_s20 = sadd.s32 1, %s959_s20   ;;  %s1213_s15 = smov %s943_s16 }
 0x290   : > { %p15_p13 = scmp.ge.s32.totalorder %s18_s20, 4   ;;  %s1214_s16 = smov %s947_s17 }
 0x291   : > { %s1215_s17 = smov %s1042_s28  ;;  %s1216_s18 = smov %s955_s19 }
 0x292   : > { %s1217_s19 = smov %s1219_s23  ;;  %17 = sbr.rel (!%p15_p13) target bundleno = 5 (0x5), region = 80 }
 0x297   :  { %676 = vsyncpa [#allocation3], 1 }
 0x298   :  { %678 = vsyncpa [#allocation3 + $0x1], 1 }
 0x299   :  { %679 = vsyncpa [#allocation4], 1 }
 0x29a   :  { %681 = vsyncpa [#allocation4 + $0x1], 1 }

</bundles_post_ra>
